<compile_context>
chip_gen: v7x
topology: tpu7x:2x2x1
jax: 0.10.0
libtpu: 0.0.40
codegen_flags: <defaults>
</compile_context>

<pallas_src>
import functools

import jax
import jax.numpy as jnp
from jax.experimental import pallas as pl
from jax.experimental.pallas import tpu as pltpu


# --------------------------------------------------------------------------
# Kernels
# --------------------------------------------------------------------------
def _rsl_kernel_f32(x_ref, wt_ref, b_ref, o_ref):
    """f32 output: accumulate directly into the resident output block."""
    k = pl.program_id(2)

    @pl.when(k == 0)
    def _():
        # Seed the accumulator with the (broadcast) bias -> no epilogue add.
        o_ref[...] = jnp.broadcast_to(b_ref[...].astype(o_ref.dtype), o_ref.shape)

    # Partial product for this K tile (one or more gang shards); the running
    # sum over the K grid axis == the gang all-reduce.
    # TODO(synk): optionally cast x/W tiles to bf16 here (keeping the f32
    # accumulator) when the module's accuracy budget allows.
    o_ref[...] += jnp.dot(
        x_ref[...], wt_ref[...], preferred_element_type=jnp.float32
    )


def _rsl_kernel_acc(x_ref, wt_ref, b_ref, o_ref, acc_ref):
    """Non-f32 output: accumulate in an f32 VMEM scratch, cast on the last step."""
    k = pl.program_id(2)

    @pl.when(k == 0)
    def _():
        acc_ref[...] = jnp.broadcast_to(b_ref[...].astype(jnp.float32), acc_ref.shape)

    acc_ref[...] += jnp.dot(
        x_ref[...], wt_ref[...], preferred_element_type=jnp.float32
    )

    @pl.when(k == pl.num_programs(2) - 1)
    def _():
        o_ref[...] = acc_ref[...].astype(o_ref.dtype)


# --------------------------------------------------------------------------
# Tiling heuristics (trace-time Python)
# --------------------------------------------------------------------------
def _cdiv(a, b):
    return -(-a // b)


def _round_up(a, b):
    return _cdiv(a, b) * b


def _tpu_generation():
    try:
        kind = jax.devices()[0].device_kind.lower()
    except Exception:
        return 6
    for g in (7, 6, 5, 4):
        if f"v{g}" in kind or f"tpu{g}" in kind:
            return g
    return 6


def _vmem_capacity_bytes(gen):
    try:
        return int(pltpu.get_tpu_info().vmem_capacity_bytes)
    except Exception:
        return (64 if gen >= 7 else 128) * 1024 * 1024


def _sublane(dtype):
    return {4: 8, 2: 16, 1: 32}.get(jnp.dtype(dtype).itemsize, 8)


def _pick_tn(n, gen):
    # Lane-dense output tiles.  v6e/v7x MXUs are 2x256x256, so prefer
    # multiples of 256; v5e (4x128x128) is happy with 128-multiples.
    if n <= 128:
        return n  # full-dim block
    cands = (512, 256, 128) if gen >= 6 else (512, 384, 256, 128)
    for c in cands:            # prefer an exact divisor (no masked last block)
        if c <= n and n % c == 0:
            return c
    for c in cands:            # otherwise largest <= n; Pallas masks the tail
        if c <= n:
            return c
    return 128


def _pick_tk(k_padded, gen):
    # As few K steps as possible: every K step costs ~0.35us of grid overhead
    # plus a full read-modify-write of the (tm, tn) accumulator.
    target = 1024 if gen >= 7 else 2048
    for c in (2048, 1024, 512, 256, 128):
        if c <= target and k_padded % c == 0:
            return c
    return k_padded  # unreachable after K is padded to a 128 multiple


def _step_vmem_bytes(tm, tk, tn, bpe, out_bpe, f32_out, w_bufs):
    # double-buffered x / bias, w_bufs-deep weight, double-buffered output,
    # plus the f32 scratch accumulator for non-f32 outputs.
    b = 2 * (tm * tk + tn) * bpe
    b += w_bufs * tk * tn * bpe
    b += 2 * tm * tn * out_bpe
    if not f32_out:
        b += tm * tn * 4
    return b


# --------------------------------------------------------------------------
# Public API
# --------------------------------------------------------------------------
def prepare_row_sharded_weight(weight_shards):
    """One-time layout prep (hoisted out of the per-call path).

    weight_shards: (gang_size, output_dim, k_shard), i.e. the per-rank weights
    held by RowShardedLinear.  Returns the (input_dim, output_dim) operand the
    kernel consumes (transposed shards concatenated along K == full W.T).
    """
    g, n, ks = weight_shards.shape
    return jnp.transpose(weight_shards, (0, 2, 1)).reshape(g * ks, n)


@functools.partial(jax.jit, static_argnames=("gang_size",))
def row_sharded_linear(x, weight_t, bias, gang_size):
    """x: (..., input_dim); weight_t: (input_dim, output_dim); bias: (output_dim,) or None."""
    *lead, input_dim = x.shape
    k_dim, output_dim = weight_t.shape
    assert k_dim == input_dim
    assert input_dim % gang_size == 0

    m = 1
    for d in lead:
        m *= d
    x2d = x.reshape(m, input_dim)

    if bias is None:
        bias = jnp.zeros((output_dim,), dtype=x.dtype)
    b2d = bias.reshape(1, output_dim)

    gen = _tpu_generation()
    vmem_cap = _vmem_capacity_bytes(gen)
    vmem_budget = int(vmem_cap * 0.75)  # headroom for compiler scratch / pipelining

    bpe = jnp.dtype(x.dtype).itemsize
    out_dtype = x.dtype
    out_bpe = jnp.dtype(out_dtype).itemsize
    f32_out = out_dtype == jnp.float32
    sub = _sublane(x.dtype)

    # K tiles must tile K exactly (no garbage may leak into the reduction):
    # zero-pad K to a lane multiple, which is numerically exact for the sum.
    # Only hit when input_dim is not 128-aligned.
    # TODO(synk): fold the weight-side K padding into prepare_row_sharded_weight
    # so it is not redone per forward call on unaligned shapes.
    k_padded = _round_up(input_dim, 128)
    if k_padded != input_dim:
        x2d = jnp.pad(x2d, ((0, 0), (0, k_padded - input_dim)))
        weight_t = jnp.pad(weight_t, ((0, k_padded - input_dim), (0, 0)))

    tn = _pick_tn(output_dim, gen)
    tk = _pick_tk(k_padded, gen)

    # tm: largest dtype-aware cap that fits the per-generation VMEM budget.
    # Weight HBM re-reads scale with M/tm, so bigger tm is the main HBM lever.
    w_bufs = 2
    tm = min(1024 if bpe <= 2 else 512, _round_up(m, sub))
    while tm > sub and _step_vmem_bytes(tm, tk, tn, bpe, out_bpe, f32_out, w_bufs) > vmem_budget:
        tm = max(sub, _round_up(tm // 2, sub))

    # v7x has 2 TensorCores: make sure small problems expose >= 2 parallel tiles.
    if gen >= 7 and _cdiv(m, tm) * _cdiv(output_dim, tn) < 2 and m > sub:
        tm = _round_up(_cdiv(m, 2), sub)

    k_steps = k_padded // tk
    # v5e: triple-buffer the streamed weight when the K loop is long enough to
    # expose the weight DMA behind short per-step MXU work (HBM ~820 GB/s).
    if gen <= 5 and k_steps >= 3:
        if _step_vmem_bytes(tm, tk, tn, bpe, out_bpe, f32_out, 3) <= vmem_budget:
            w_bufs = 3

    grid = (_cdiv(m, tm), _cdiv(output_dim, tn), k_steps)

    if f32_out:
        kernel = _rsl_kernel_f32
        scratch = []
    else:
        kernel = _rsl_kernel_acc
        scratch = [pltpu.VMEM((tm, tn), jnp.float32)]

    step_bytes = _step_vmem_bytes(tm, tk, tn, bpe, out_bpe, f32_out, w_bufs)
    vmem_limit = int(min(vmem_cap * 0.85,
                         max(32 * 1024 * 1024, step_bytes + (4 << 20))))

    # Actual HBM traffic: x read once, W re-streamed once per M tile, output
    # written once, bias read once.
    cost = pl.CostEstimate(
        flops=2 * m * input_dim * output_dim,
        transcendentals=0,
        bytes_accessed=(m * k_padded * bpe
                        + grid[0] * k_padded * output_dim * bpe
                        + m * output_dim * out_bpe
                        + output_dim * bpe),
    )

    if w_bufs == 2:
        w_spec = pl.BlockSpec((tk, tn), lambda i, j, k: (k, j))
    else:
        w_spec = pl.BlockSpec((tk, tn), lambda i, j, k: (k, j),
                              pipeline_mode=pl.Buffered(w_bufs))

    out = pl.pallas_call(
        kernel,
        out_shape=jax.ShapeDtypeStruct((m, output_dim), out_dtype),
        grid_spec=pltpu.PrefetchScalarGridSpec(
            num_scalar_prefetch=0,
            grid=grid,
            in_specs=[
                pl.BlockSpec((tm, tk), lambda i, j, k: (i, k)),   # x tile
                w_spec,                                           # W.T tile (shards)
                pl.BlockSpec((1, tn), lambda i, j, k: (0, j)),    # bias tile
            ],
            out_specs=pl.BlockSpec((tm, tn), lambda i, j, k: (i, j)),
            scratch_shapes=scratch,
        ),
        compiler_params=pltpu.CompilerParams(
            dimension_semantics=("parallel", "parallel", "arbitrary"),
            vmem_limit_bytes=vmem_limit,
        ),
        cost_estimate=cost,
    )(x2d, weight_t, b2d)

    return out.reshape(*lead, output_dim)


if __name__ == "__main__":
    # gang / module configuration
    GANG_SIZE = 4
    INPUT_DIM = 512     # multiple of gang size; shard = 128 (lane-aligned)
    OUTPUT_DIM = 128
    BATCH, SEQ = 2, 8

    key = jax.random.PRNGKey(0)
    k_w, k_b, k_x = jax.random.split(key, 3)

    # Deterministic init matching _init_uniform:
    #   kaiming_uniform_(a=sqrt(5)) on (out, in) -> U(-1/sqrt(fan_in), 1/sqrt(fan_in))
    #   bias -> U(-1/sqrt(fan_in), 1/sqrt(fan_in))
    fan_in = INPUT_DIM
    bound = 1.0 / (fan_in ** 0.5)
    weight = jax.random.uniform(
        k_w, (OUTPUT_DIM, INPUT_DIM), jnp.float32, -bound, bound
    )
    bias = jax.random.uniform(k_b, (OUTPUT_DIM,), jnp.float32, -bound, bound)

    x = jax.random.normal(k_x, (BATCH, SEQ, INPUT_DIM), jnp.float32)

    # Per-rank weight shards exactly as RowShardedLinear._copy_weight builds them.
    weight_shards = jnp.stack(jnp.split(weight, GANG_SIZE, axis=1))  # (G, N, K/G)

    # One-time layout prep, hoisted out of the per-forward path.
    weight_t = prepare_row_sharded_weight(weight_shards)             # (K, N)

    out = row_sharded_linear(x, weight_t, bias, GANG_SIZE)
    out = jax.block_until_ready(out)

    # reference: full (unsharded) linear = scatter + per-shard linear + reduce + bias
    ref = jnp.einsum("bsk,nk->bsn", x, weight) + bias
    assert out.shape == (BATCH, SEQ, OUTPUT_DIM)
    assert jnp.allclose(out, ref, atol=1e-4, rtol=1e-4)

    print("KERNEL_OK")
</pallas_src>

<mosaic_0001>
module attributes {stable_mosaic.version = 11 : i64} {
  func.func @_rsl_kernel_f32(%arg0: i32, %arg1: i32, %arg2: i32, %arg3: memref<16x512xf32, #tpu.memory_space<vmem>>, %arg4: memref<512x128xf32, #tpu.memory_space<vmem>>, %arg5: memref<1x128xf32, #tpu.memory_space<vmem>>, %arg6: memref<16x128xf32, #tpu.memory_space<vmem>>) attributes {dimension_semantics = [#tpu.dimension_semantics<parallel>, #tpu.dimension_semantics<parallel>, #tpu.dimension_semantics<arbitrary>], iteration_bounds = array<i64: 1, 1, 1>, scalar_prefetch = 0 : i64, scratch_operands = 0 : i64, tpu.core_type = #tpu.core_type<tc>, window_params = [{transform_indices = @transform_0, window_bounds = array<i64: 16, 512>}, {transform_indices = @transform_1, window_bounds = array<i64: 512, 128>}, {transform_indices = @transform_2, window_bounds = array<i64: 1, 128>}, {transform_indices = @transform_3, window_bounds = array<i64: 16, 128>}]} {
    %c0_i32 = arith.constant 0 : i32
    %0 = arith.cmpi eq, %arg2, %c0_i32 : i32
    %1 = arith.extui %0 : i1 to i32
    %c0_i32_0 = arith.constant 0 : i32
    %2 = arith.cmpi ne, %1, %c0_i32_0 : i32
    scf.if %2 {
      %c0_8 = arith.constant 0 : index
      %c0_9 = arith.constant 0 : index
      %9 = vector.load %arg5[%c0_8, %c0_9] : memref<1x128xf32, #tpu.memory_space<vmem>>, vector<1x128xf32>
      %10 = vector.shape_cast %9 : vector<1x128xf32> to vector<1x128xf32>
      %11 = vector.broadcast %10 : vector<1x128xf32> to vector<16x128xf32>
      %c0_10 = arith.constant 0 : index
      %c0_11 = arith.constant 0 : index
      %12 = vector.load %arg6[%c0_10, %c0_11] : memref<16x128xf32, #tpu.memory_space<vmem>>, vector<16x128xf32>
      tpu.vector_store %arg6[%c0_10, %c0_11], %11 {strides = array<i32>} : memref<16x128xf32, #tpu.memory_space<vmem>>, vector<16x128xf32>,
    } else {
    }
    %c0 = arith.constant 0 : index
    %c0_1 = arith.constant 0 : index
    %3 = vector.load %arg6[%c0, %c0_1] : memref<16x128xf32, #tpu.memory_space<vmem>>, vector<16x128xf32>
    %c0_2 = arith.constant 0 : index
    %c0_3 = arith.constant 0 : index
    %4 = vector.load %arg3[%c0_2, %c0_3] : memref<16x512xf32, #tpu.memory_space<vmem>>, vector<16x512xf32>
    %c0_4 = arith.constant 0 : index
    %c0_5 = arith.constant 0 : index
    %5 = vector.load %arg4[%c0_4, %c0_5] : memref<512x128xf32, #tpu.memory_space<vmem>>, vector<512x128xf32>
    %cst = arith.constant dense<0.000000e+00> : vector<16x128xf32>
    %6 = tpu.matmul %4, %5, %cst {dimension_numbers = #tpu.dot_dimension_numbers<[1], [0], [0], [1], [0, 0, 1, 1], [], []>} : vector<16x512xf32>, vector<512x128xf32>, vector<16x128xf32> -> vector<16x128xf32>
    %7 = arith.addf %3, %6 : vector<16x128xf32>
    %c0_6 = arith.constant 0 : index
    %c0_7 = arith.constant 0 : index
    %8 = vector.load %arg6[%c0_6, %c0_7] : memref<16x128xf32, #tpu.memory_space<vmem>>, vector<16x128xf32>
    tpu.vector_store %arg6[%c0_6, %c0_7], %7 {strides = array<i32>} : memref<16x128xf32, #tpu.memory_space<vmem>>, vector<16x128xf32>,
    return
  }
  func.func @transform_0(%arg0: i32, %arg1: i32, %arg2: i32) -> (i32, i32) {
    %c0_i32 = arith.constant 0 : i32
    return %arg0, %arg2 : i32, i32
  }
  func.func @transform_1(%arg0: i32, %arg1: i32, %arg2: i32) -> (i32, i32) {
    %c0_i32 = arith.constant 0 : i32
    return %arg2, %arg1 : i32, i32
  }
  func.func @transform_2(%arg0: i32, %arg1: i32, %arg2: i32) -> (i32, i32) {
    %c0_i32 = arith.constant 0 : i32
    %c0_i32_0 = arith.constant 0 : i32
    return %c0_i32, %arg1 : i32, i32
  }
  func.func @transform_3(%arg0: i32, %arg1: i32, %arg2: i32) -> (i32, i32) {
    %c0_i32 = arith.constant 0 : i32
    return %arg0, %arg1 : i32, i32
  }
}

</mosaic_0001>

<bundles_post_ra>
// kernel: row_sharded_linear.1
= control target key start
LH: loop header
LB: loop body
LE: loop exit
PB: predicated region body
PF: predicated region fallthrough
CT: control target
= control target key end

     0   :  { %8 = vsyncpa [#allocation3], 0  ;;  %s594_s0 = inlined_call_operand.hbm [shape: f32[16,512], index: 0, kind: input, shape index: {}]   ;;  %s595_s1 = inlined_call_operand.hbm [shape: f32[512,128], index: 1, kind: input, shape index: {}]   ;;  %s596_s2 = inlined_call_operand.vmem [shape: f32[1,128], index: 2, kind: input, shape index: {}]   ;;  %s597_s3 = inlined_call_operand.hbm [shape: f32[16,128], index: 3, kind: output, shape index: {}]  }
   0x1   :  { %9 = vsyncpa [#allocation6], 0 }
   0x2   :  { %10 = vsyncpa [#allocation4], 0  ;;  %s522_s12 = smov [#allocation2]   ;;  %s450_s16 = scalar_lea.hbm %s594_s0, 1024 }
   0x3   :  { %s16_s13 = sshll.u32 %s522_s12, 4  ;;  %p451_p0 = scmp.ne.s32.totalorder %s594_s0, %s450_s16  ;;  %s17_s13 = int_to_ptr.vmem [resolvable:$true] %s16_s13 }
   0x4   :  { %p454_p1 = scmp.lt.u32.totalorder %s450_s16, %s594_s0 }
   0x6   :  { %p456_p2 = pnand %p454_p1, %p451_p0 }
   0x8   :  { %459 = shalt.err (!%p456_p2)
}
   0x9   :  { %s460_s21 = scalar_lea.vmem %s17_s13, 1024  ;;  %p465_p4 = scmp.lt.s32.totalorder %s17_s13, %s17_s13 }
   0xa   :  { %p461_p3 = scmp.ne.s32.totalorder %s17_s13, %s460_s21  ;;  %p466_p5 = scmp.lt.s32.totalorder %s460_s21, %s460_s21 }
   0xc   :  { %p467_p6 = por %p466_p5, %p465_p4 }
   0xe   :  { %p468_p7 = pnand %p467_p6, %p461_p3 }
  0x10   :  { %471 = shalt.err (!%p468_p7)
}
  0x11   :  { %s523_s22 = smov 512   ;;  %s524_s23 = smov 32  }
  0x12   :  { %22 = dma.hbm_to_vmem [thread:$0]  %s594_s0, 1024, %s17_s13, [#allocation3], %s523_s22, %s523_s22, %s524_s23  }
  0x13   :  { %s525_s26 = smov [#allocation5]   ;;  %s472_s30 = scalar_lea.hbm %s595_s1, 8192 }
  0x14   :  { %s28_s27 = sshll.u32 %s525_s26, 4  ;;  %p473_p8 = scmp.ne.s32.totalorder %s595_s1, %s472_s30  ;;  %s29_s27 = int_to_ptr.vmem [resolvable:$true] %s28_s27 }
  0x15   :  { %p476_p9 = scmp.lt.u32.totalorder %s472_s30, %s595_s1 }
  0x17   :  { %p478_p10 = pnand %p476_p9, %p473_p8 }
  0x19   :  { %481 = shalt.err (!%p478_p10)
}
  0x1a   :  { %s482_s8 = scalar_lea.vmem %s29_s27, 8192  ;;  %p487_p12 = scmp.lt.s32.totalorder %s29_s27, %s29_s27 }
  0x1b   :  { %p483_p11 = scmp.ne.s32.totalorder %s29_s27, %s482_s8  ;;  %p488_p13 = scmp.lt.s32.totalorder %s482_s8, %s482_s8 }
  0x1d   :  { %p489_p0 = por %p488_p13, %p487_p12 }
  0x1f   :  { %p490_p1 = pnand %p489_p0, %p483_p11 }
  0x21   :  { %493 = shalt.err (!%p490_p1)
}
  0x22   :  { %s526_s0 = smov 128   ;;  %s527_s9 = smov 8  }
  0x23   :  { %34 = dma.hbm_to_vmem [thread:$0]  %s595_s1, 8192, %s29_s27, [#allocation6], %s526_s0, %s526_s0, %s527_s9  }
  0x24   :  { %516 = dma.done.wait [#allocation3], 1024  }
  0x25   :  { %517 = vsyncadd [#allocation3], 4294966272 }
  0x26   :  { %518 = dma.done.wait [#allocation6], 8192  }
  0x27   :  { %519 = vsyncadd [#allocation6], 4294959104  ;;  %v82_v0 = vld [vmem:[#allocation5 + $0x80] sm:$0xff]  ;;  %v83_v1 = vld [vmem:[#allocation5 + $0x88] sm:$0xff]  ;;  %s528_s13 = smov [#allocation7]  }
  0x28   :  { %v114_v2 = vld [vmem:[#allocation5 + $0x180] sm:$0xff]  ;;  %v379_v3 = vpack.c.bf16 %v83_v1, %v82_v0  ;;  %v115_v4 = vld [vmem:[#allocation5 + $0x188] sm:$0xff]  ;;  %v84_v11 = vld [vmem:[#allocation5 + $0x90] sm:$0xff]  ;;  %s289_s14 = sshll.u32 %s528_s13, 4  ;;  %s290_s14 = int_to_ptr.vmem [resolvable:$true] %s289_s14 }
  0x29   :  { %v66_v5 = vld [vmem:[#allocation5] sm:$0xff]  ;;  %v67_v6 = vld [vmem:[#allocation5 + $0x8] sm:$0xff]  ;;  %v411_v7 = vpack.c.bf16 %v115_v4, %v114_v2  ;;  %v85_v13 = vld [vmem:[#allocation5 + $0x98] sm:$0xff]  ;;  %s494_s15 = scalar_lea.vmem %s290_s14, 256  ;;  %p499_p3 = scmp.lt.s32.totalorder %s290_s14, %s290_s14 }
  0x2a   :  { %v381_v8 = vpack.c.bf16 %v67_v6, %v66_v5  ;;  %v98_v9 = vld [vmem:[#allocation5 + $0x100] sm:$0xff]  ;;  %v99_v10 = vld [vmem:[#allocation5 + $0x108] sm:$0xff]  ;;  %380 = vmatprep.subr.bf16.mxu0 %v379_v3  ;;  %v116_v14 = vld [vmem:[#allocation5 + $0x190] sm:$0xff]  ;;  %v383_v16 = vpack.c.bf16 %v85_v13, %v84_v11  ;;  %p495_p2 = scmp.ne.s32.totalorder %s290_s14, %s494_s15  ;;  %p500_p4 = scmp.lt.s32.totalorder %s494_s15, %s494_s15 }
  0x2b   :  { %v413_v12 = vpack.c.bf16 %v99_v10, %v98_v9  ;;  %v117_v15 = vld [vmem:[#allocation5 + $0x198] sm:$0xff]  ;;  %412 = vmatprep.subr.bf16.mxu1 %v411_v7  ;;  %v68_v18 = vld [vmem:[#allocation5 + $0x10] sm:$0xff]  ;;  %v86_v23 = vld [vmem:[#allocation5 + $0xa0] sm:$0xff] }
  0x2c   :  { %382 = vmatpush3.bf16.msra.mxu0 %v381_v8  ;;  %v415_v17 = vpack.c.bf16 %v117_v15, %v116_v14  ;;  %v69_v19 = vld [vmem:[#allocation5 + $0x18] sm:$0xff]  ;;  %v100_v20 = vld [vmem:[#allocation5 + $0x110] sm:$0xff]  ;;  %v87_v24 = vld [vmem:[#allocation5 + $0xa8] sm:$0xff]  ;;  %p501_p5 = por %p500_p4, %p499_p3 }
  0x2d   :  { %414 = vmatpush3.bf16.msra.mxu1 %v413_v12  ;;  %v385_v21 = vpack.c.bf16 %v69_v19, %v68_v18  ;;  %v101_v22 = vld [vmem:[#allocation5 + $0x118] sm:$0xff]  ;;  %384 = vmatprep.subr.bf16.mxu0 %v383_v16  ;;  %v387_v26 = vpack.c.bf16 %v87_v24, %v86_v23  ;;  %v118_v27 = vld [vmem:[#allocation5 + $0x1a0] sm:$0xff]  ;;  %v119_v28 = vld [vmem:[#allocation5 + $0x1a8] sm:$0xff] }
  0x2e   :  { %416 = vmatprep.subr.bf16.mxu1 %v415_v17  ;;  %v417_v25 = vpack.c.bf16 %v101_v22, %v100_v20  ;;  %v70_v29 = vld [vmem:[#allocation5 + $0x20] sm:$0xff]  ;;  %v419_v30 = vpack.c.bf16 %v119_v28, %v118_v27  ;;  %v71_v31 = vld [vmem:[#allocation5 + $0x28] sm:$0xff]  ;;  %v88_v35 = vld [vmem:[#allocation5 + $0xb0] sm:$0xff]  ;;  %p502_p6 = pnand %p501_p5, %p495_p2 }
  0x2f   :  { %v102_v32 = vld [vmem:[#allocation5 + $0x120] sm:$0xff]  ;;  %v103_v33 = vld [vmem:[#allocation5 + $0x128] sm:$0xff]  ;;  %v389_v34 = vpack.c.bf16 %v71_v31, %v70_v29  ;;  %v89_v36 = vld [vmem:[#allocation5 + $0xb8] sm:$0xff] }
  0x30   :  { %386 = vmatpush3.bf16.msra.mxu0 %v385_v21  ;;  %v120_v37 = vld [vmem:[#allocation5 + $0x1b0] sm:$0xff]  ;;  %v421_v38 = vpack.c.bf16 %v103_v33, %v102_v32  ;;  %v391_v39 = vpack.c.bf16 %v89_v36, %v88_v35  ;;  %v121_v40 = vld [vmem:[#allocation5 + $0x1b8] sm:$0xff]  ;;  %v90_v46 = vld [vmem:[#allocation5 + $0xc0] sm:$0xff] }
  0x31   :  { %418 = vmatpush3.bf16.msra.mxu1 %v417_v25  ;;  %388 = vmatprep.subr.bf16.mxu0 %v387_v26  ;;  %v72_v41 = vld [vmem:[#allocation5 + $0x30] sm:$0xff]  ;;  %v73_v42 = vld [vmem:[#allocation5 + $0x38] sm:$0xff]  ;;  %v423_v43 = vpack.c.bf16 %v121_v40, %v120_v37  ;;  %v91_v47 = vld [vmem:[#allocation5 + $0xc8] sm:$0xff] }
  0x32   :  { %420 = vmatprep.subr.bf16.mxu1 %v419_v30  ;;  %v104_v44 = vld [vmem:[#allocation5 + $0x130] sm:$0xff]  ;;  %v105_v45 = vld [vmem:[#allocation5 + $0x138] sm:$0xff]  ;;  %v122_v48 = vld [vmem:[#allocation5 + $0x1c0] sm:$0xff]  ;;  %v393_v50 = vpack.c.bf16 %v73_v42, %v72_v41  ;;  %v395_v52 = vpack.c.bf16 %v91_v47, %v90_v46 }
  0x33   :  { %v123_v49 = vld [vmem:[#allocation5 + $0x1c8] sm:$0xff]  ;;  %v425_v51 = vpack.c.bf16 %v105_v45, %v104_v44  ;;  %v74_v53 = vld [vmem:[#allocation5 + $0x40] sm:$0xff]  ;;  %v92_v58 = vld [vmem:[#allocation5 + $0xd0] sm:$0xff] }
  0x34   :  { %390 = vmatpush3.bf16.msra.mxu0 %v389_v34  ;;  %v75_v54 = vld [vmem:[#allocation5 + $0x48] sm:$0xff]  ;;  %v106_v55 = vld [vmem:[#allocation5 + $0x140] sm:$0xff]  ;;  %v427_v56 = vpack.c.bf16 %v123_v49, %v122_v48  ;;  %v93_v59 = vld [vmem:[#allocation5 + $0xd8] sm:$0xff] }
  0x35   :  { %422 = vmatpush3.bf16.msra.mxu1 %v421_v38  ;;  %392 = vmatprep.subr.bf16.mxu0 %v391_v39  ;;  %v107_v57 = vld [vmem:[#allocation5 + $0x148] sm:$0xff]  ;;  %v124_v60 = vld [vmem:[#allocation5 + $0x1d0] sm:$0xff]  ;;  %v125_v61 = vld [vmem:[#allocation5 + $0x1d8] sm:$0xff]  ;;  %v397_v62 = vpack.c.bf16 %v75_v54, %v74_v53  ;;  %v399_v0 = vpack.c.bf16 %v93_v59, %v92_v58 }
  0x36   :  { %424 = vmatprep.subr.bf16.mxu1 %v423_v43  ;;  %v429_v63 = vpack.c.bf16 %v107_v57, %v106_v55  ;;  %v76_v1 = vld [vmem:[#allocation5 + $0x50] sm:$0xff]  ;;  %v77_v2 = vld [vmem:[#allocation5 + $0x58] sm:$0xff]  ;;  %v431_v4 = vpack.c.bf16 %v125_v61, %v124_v60  ;;  %v94_v6 = vld [vmem:[#allocation5 + $0xe0] sm:$0xff] }
  0x37   :  { %v108_v3 = vld [vmem:[#allocation5 + $0x150] sm:$0xff]  ;;  %v109_v5 = vld [vmem:[#allocation5 + $0x158] sm:$0xff]  ;;  %v95_v7 = vld [vmem:[#allocation5 + $0xe8] sm:$0xff]  ;;  %v401_v10 = vpack.c.bf16 %v77_v2, %v76_v1 }
  0x38   :  { %394 = vmatpush3.bf16.msra.mxu0 %v393_v50  ;;  %v126_v8 = vld [vmem:[#allocation5 + $0x1e0] sm:$0xff]  ;;  %v127_v9 = vld [vmem:[#allocation5 + $0x1e8] sm:$0xff]  ;;  %v433_v13 = vpack.c.bf16 %v109_v5, %v108_v3  ;;  %v403_v14 = vpack.c.bf16 %v95_v7, %v94_v6  ;;  %v61_v17 = vld [vmem:[#allocation2 + $0x18] sm:$0xff] }
  0x39   :  { %426 = vmatpush3.bf16.msra.mxu1 %v425_v51  ;;  %396 = vmatprep.subr.bf16.mxu0 %v395_v52  ;;  %v78_v11 = vld [vmem:[#allocation5 + $0x60] sm:$0xff]  ;;  %v79_v12 = vld [vmem:[#allocation5 + $0x68] sm:$0xff]  ;;  %v435_v18 = vpack.c.bf16 %v127_v9, %v126_v8  ;;  %v96_v20 = vld [vmem:[#allocation5 + $0xf0] sm:$0xff] }
  0x3a   :  { %428 = vmatprep.subr.bf16.mxu1 %v427_v56  ;;  %v110_v15 = vld [vmem:[#allocation5 + $0x160] sm:$0xff]  ;;  %v59_v16 = vld [vmem:[#allocation2 + $0x8] sm:$0xff]  ;;  %v97_v21 = vld [vmem:[#allocation5 + $0xf8] sm:$0xff]  ;;  %269 = vmatprep.mubr.f32.mxu1 %v61_v17  ;;  %v405_v24 = vpack.c.bf16 %v79_v12, %v78_v11 }
  0x3b   :  { %v111_v19 = vld [vmem:[#allocation5 + $0x168] sm:$0xff]  ;;  %194 = vmatprep.mubr.f32.mxu0 %v59_v16  ;;  %v128_v22 = vld [vmem:[#allocation5 + $0x1f0] sm:$0xff]  ;;  %v129_v23 = vld [vmem:[#allocation5 + $0x1f8] sm:$0xff]  ;;  %v407_v26 = vpack.c.bf16 %v97_v21, %v96_v20 }
  0x3c   :  { %398 = vmatpush3.bf16.msra.mxu0 %v397_v62  ;;  %v437_v25 = vpack.c.bf16 %v111_v19, %v110_v15  ;;  %v80_v27 = vld [vmem:[#allocation5 + $0x70] sm:$0xff]  ;;  %v81_v28 = vld [vmem:[#allocation5 + $0x78] sm:$0xff]  ;;  %v439_v29 = vpack.c.bf16 %v129_v23, %v128_v22  ;;  %v58_v34 = vld [vmem:[#allocation2] sm:$0xff] }
  0x3d   :  { %430 = vmatpush3.bf16.msra.mxu1 %v429_v63  ;;  %400 = vmatprep.subr.bf16.mxu0 %v399_v0  ;;  %v112_v30 = vld [vmem:[#allocation5 + $0x170] sm:$0xff]  ;;  %v113_v31 = vld [vmem:[#allocation5 + $0x178] sm:$0xff]  ;;  %v409_v32 = vpack.c.bf16 %v81_v28, %v80_v27  ;;  %v63_v36 = vld [vmem:[#allocation2 + $0x28] sm:$0xff] }
  0x3e   :  { %432 = vmatprep.subr.bf16.mxu1 %v431_v4  ;;  %v441_v33 = vpack.c.bf16 %v113_v31, %v112_v30  ;;  %v60_v35 = vld [vmem:[#allocation2 + $0x10] sm:$0xff]  ;;  %v65_v37 = vld [vmem:[#allocation2 + $0x38] sm:$0xff]  ;;  %v62_v38 = vld [vmem:[#allocation2 + $0x20] sm:$0xff] }
  0x3f   :  { %v64_v39 = vld [vmem:[#allocation2 + $0x30] sm:$0xff]  ;;  %v302_v46 = vld [vmem:[%s596_s2] ss:$0 sm:$0xff] }
  0x40   :  { %402 = vmatpush3.bf16.msra.mxu0 %v401_v10 }
  0x41   :  { %434 = vmatpush3.bf16.msra.mxu1 %v433_v13  ;;  %404 = vmatprep.subr.bf16.mxu0 %v403_v14 }
  0x42   :  { %436 = vmatprep.subr.bf16.mxu1 %v435_v18 }
  0x44   :  { %406 = vmatpush3.bf16.msra.mxu0 %v405_v24 }
  0x45   :  { %438 = vmatpush3.bf16.msra.mxu1 %v437_v25  ;;  %408 = vmatprep.subr.bf16.mxu0 %v407_v26 }
  0x46   :  { %440 = vmatprep.subr.bf16.mxu1 %v439_v29 }
  0x48   :  { %410 = vmatpush3.bf16.msra.mxu0 %v409_v32 }
  0x49   :  { %442 = vmatpush3.bf16.msra.mxu1 %v441_v33 }
  0x4b   :  { %195 = vmatmul.mubr.f32.vlgmr.msra.gmra.mrb[0].mxu0 %v58_v34 }
  0x4c   :  { %270 = vmatmul.mubr.f32.vlgmr.msra.gmra.mrb[0].mxu1 %v60_v35  ;;  %199 = vmatprep.mubr.f32.mxu0 %v63_v36 }
  0x4d   :  { %274 = vmatprep.mubr.f32.mxu1 %v65_v37 }
  0x4f   :  { %200 = vmatmul.mubr.f32.gmra.mrb[2].mxu0 %v62_v38 }
  0x50   :  { %275 = vmatmul.mubr.f32.gmra.mrb[2].mxu1 %v64_v39 }
 0x11e   :  { %v335_v40 = vpop.f32.mrb[0].mxu0 }
 0x11f   :  { %v373_v41 = vpop.f32.mrb[0].mxu1  ;;  %v336_v42 = vpop.f32.mrb[1].mxu0 }
 0x120   :  { %v337_v43 = vadd.f32 %v336_v42, %v335_v40  ;;  %v374_v44 = vpop.f32.mrb[1].mxu1 }
 0x121   :  { %v375_v45 = vadd.f32 %v374_v44, %v373_v41 }
 0x122   :  { %v338_v47 = vpop.f32.mrb[2].mxu0 }
 0x123   :  { %v272_v48 = vadd.f32 %v375_v45, %v337_v43  ;;  %v376_v49 = vpop.f32.mrb[2].mxu1  ;;  %v339_v50 = vpop.f32.mrb[3].mxu0 }
 0x124   :  { %v340_v51 = vadd.f32 %v339_v50, %v338_v47  ;;  %v377_v52 = vpop.f32.mrb[3].mxu1 }
 0x125   :  { %v280_v53 = vadd.f32 %v302_v46, %v272_v48  ;;  %v378_v54 = vadd.f32 %v377_v52, %v376_v49 }
 0x127   :  { %282 = vst [vmem:[#allocation7] sm:$0xff] %v280_v53  ;;  %v277_v55 = vadd.f32 %v378_v54, %v340_v51 }
 0x129   :  { %v281_v56 = vadd.f32 %v302_v46, %v277_v55 }
 0x12b   :  { %283 = vst [vmem:[#allocation7 + $0x8] sm:$0xff] %v281_v56 }
 0x12c   :  { %505 = shalt.err (!%p502_p6)
}
 0x12d   :  { %s506_s17 = scalar_lea.hbm %s597_s3, 256 }
 0x12e   :  { %p507_p7 = scmp.ne.s32.totalorder %s597_s3, %s506_s17  ;;  %p510_p8 = scmp.lt.u32.totalorder %s506_s17, %s597_s3 }
 0x130   :  { %p512_p9 = pnand %p510_p8, %p507_p7 }
 0x132   :  { %515 = shalt.err (!%p512_p9)
}
 0x133   :  { %295 = dma.vmem_to_hbm [thread:$0]  %s290_s14, 256, %s597_s3, [#allocation4], %s526_s0, %s526_s0, %s527_s9  }
 0x134   :  { %520 = dma.done.wait [#allocation4], 256  }
 0x135   :  { %521 = vsyncadd [#allocation4], 4294967040 }
 0x136   :  { %299 = vsyncpa [#allocation3], 1 }
 0x137   :  { %300 = vsyncpa [#allocation6], 1 }
 0x138   :  { %301 = vsyncpa [#allocation4], 1 }

</bundles_post_ra>
